<compile_context>
chip_gen: v7x
topology: tpu7x:2x2x1
jax: 0.10.0
libtpu: 0.0.40
codegen_flags: <defaults>
</compile_context>

<pallas_src>
from itertools import accumulate

import jax
import jax.numpy as jnp
import numpy as np
from jax.experimental import pallas as pl
from jax.experimental.pallas import tpu as pltpu


_LANE = 128
_TINY_BYTES = 256 * 1024            # below this, one VMEM slab beats many small DMAs
_VMEM_BLOCK_BUDGET = 2 * 1024 * 1024  # per-input-block bytes for the gridded fallback
                                      # (in + outs ~= 2x, x2 double-buffer ~= 8 MiB,
                                      #  safe on v5e 16 MiB scoped / v7x 64 MiB physical)


def _compute_split_idx(length, split_size_or_sections):
    """Reproduces Split.__init__ split_idx logic."""
    if isinstance(split_size_or_sections, int):
        if length % split_size_or_sections != 0:
            raise ValueError("chunk size does not divide the axis length")
        n = length // split_size_or_sections
        return [i * split_size_or_sections for i in range(n + 1)]
    elif isinstance(split_size_or_sections, (list, tuple)) and all(
        isinstance(s, int) for s in split_size_or_sections
    ):
        if sum(split_size_or_sections) != length:
            raise ValueError("sum of sections does not match axis length")
        return [0] + list(accumulate(split_size_or_sections))
    else:
        raise ValueError("split_size_or_sections must be int or list of ints")


def _sublane_tile(dtype):
    return {4: 8, 2: 16, 1: 32}.get(jnp.dtype(dtype).itemsize, 8)


def _pick_tile(extent, granule, bytes_per_elem):
    """Largest tile (multiple of `granule` dividing `extent`, or the full extent)
    whose block stays within the per-block VMEM budget."""
    if extent * bytes_per_elem <= _VMEM_BLOCK_BUDGET:
        return extent
    t = (_VMEM_BLOCK_BUDGET // bytes_per_elem) // granule * granule
    while t >= granule:
        if extent % t == 0:
            return t
        t -= granule
    return extent  # no conforming divisor fits; use full extent (rare, still correct)


# ---------------------------------------------------------------------------
# Kernel bodies
# ---------------------------------------------------------------------------

def _make_dma_split_kernel(axis, chunks, ndim):
    """Pure-DMA split: one HBM->HBM async copy per chunk, all in flight at once."""
    n = len(chunks)

    def kernel(x_ref, *refs):
        out_refs = refs[:n]
        sem = refs[n]  # DMA semaphore array, one slot per chunk
        copies = []
        # Issue every chunk copy first so all DMA engines are busy concurrently.
        for i, (start, size) in enumerate(chunks):
            idx = tuple(
                pl.ds(start, size) if d == axis else slice(None) for d in range(ndim)
            )
            cp = pltpu.make_async_copy(x_ref.at[idx], out_refs[i], sem.at[i])
            cp.start()
            copies.append(cp)
        for cp in copies:
            cp.wait()

    return kernel


def _make_vmem_split_kernel(axis, chunks, ndim):
    """VMEM-staged split body: slice the Ref per chunk (no whole-block vreg residency)."""

    def kernel(x_ref, *out_refs):
        for (start, size), o_ref in zip(chunks, out_refs):
            idx = tuple(
                slice(start, start + size) if d == axis else slice(None)
                for d in range(ndim)
            )
            o_ref[...] = x_ref[idx]

    return kernel


# ---------------------------------------------------------------------------
# pallas_call wrappers for the three paths
# ---------------------------------------------------------------------------

def _dma_split(x, axis, chunks, out_shapes):
    kernel = _make_dma_split_kernel(axis, chunks, x.ndim)
    return pl.pallas_call(
        kernel,
        out_shape=out_shapes,
        in_specs=[pl.BlockSpec(memory_space=pl.ANY)],
        out_specs=tuple(pl.BlockSpec(memory_space=pl.ANY) for _ in out_shapes),
        scratch_shapes=[pltpu.SemaphoreType.DMA((len(chunks),))],
        # Outputs are produced only via async copies; keep them immune to DCE.
        compiler_params=pltpu.CompilerParams(has_side_effects=True),
    )(x)


def _tiny_vmem_split(x, axis, chunks, out_shapes):
    """Single whole-array VMEM block; only used when total input < _TINY_BYTES."""
    kernel = _make_vmem_split_kernel(axis, chunks, x.ndim)
    zero_idx = lambda: (0,) * x.ndim
    return pl.pallas_call(
        kernel,
        out_shape=out_shapes,
        in_specs=[pl.BlockSpec(x.shape, zero_idx)],
        out_specs=tuple(pl.BlockSpec(s.shape, zero_idx) for s in out_shapes),
    )(x)


def _gridded_vmem_split(x, axis, chunks, out_shapes, sub_tile, itemsize):
    """Pipelined VMEM fallback for misaligned splits on the last two dims.

    Grid over the leading dims (block 1 each) plus a conforming tile of the
    non-split minor dim; the split axis stays whole inside each block.
    """
    ndim = x.ndim
    shape = x.shape
    L = shape[-1]
    kernel = _make_vmem_split_kernel(axis, chunks, ndim)

    if axis == ndim - 1:
        # Misaligned lane-dim split: lane dim stays full; tile the sublane dim.
        S = shape[-2]
        tr = _pick_tile(S, sub_tile, L * itemsize)
        grid = tuple(shape[: ndim - 2]) + (pl.cdiv(S, tr),)

        def idx_map(*g):
            return (*g, 0)

        in_spec = pl.BlockSpec((1,) * (ndim - 2) + (tr, L), idx_map)
        out_specs = tuple(
            pl.BlockSpec((1,) * (ndim - 2) + (tr, size), idx_map)
            for (_, size) in chunks
        )
    else:
        # Misaligned sublane-dim split (axis == ndim-2): split dim stays full;
        # tile the lane dim in multiples of 128.
        S = shape[axis]
        tl = _pick_tile(L, _LANE, S * itemsize)
        grid = tuple(shape[:axis]) + (pl.cdiv(L, tl),)

        def idx_map(*g):
            return (*g[:-1], 0, g[-1])

        in_spec = pl.BlockSpec((1,) * axis + (S, tl), idx_map)
        out_specs = tuple(
            pl.BlockSpec((1,) * axis + (size, tl), idx_map) for (_, size) in chunks
        )

    return pl.pallas_call(
        kernel,
        out_shape=out_shapes,
        grid=grid,
        in_specs=[in_spec],
        out_specs=out_specs,
        compiler_params=pltpu.CompilerParams(
            dimension_semantics=("parallel",) * len(grid)
        ),
    )(x)


# ---------------------------------------------------------------------------
# Public entry point (== Split.forward for a single input tensor)
# ---------------------------------------------------------------------------

def split_pallas(x, axis, split_size_or_sections):
    """Pallas equivalent of Split.forward.

    `axis` follows the PyTorch module convention: it indexes a tensor dimension
    with batch at dim 0, so axis >= 1.
    """
    if not (isinstance(axis, int) and axis >= 1):
        raise ValueError("axis must be a positive integer (non-batch dim)")
    if axis >= x.ndim:
        raise ValueError("input does not have the indicated axis")

    ndim = x.ndim
    itemsize = jnp.dtype(x.dtype).itemsize
    sub_tile = _sublane_tile(x.dtype)

    split_idx = _compute_split_idx(x.shape[axis], split_size_or_sections)
    n_out = len(split_idx) - 1
    sizes = [split_idx[i + 1] - split_idx[i] for i in range(n_out)]
    out_shapes_all = [
        tuple(sizes[i] if d == axis else s for d, s in enumerate(x.shape))
        for i in range(n_out)
    ]

    # torch.split tolerates zero-sized sections; they carry no data, so build
    # them outside the kernel and only route non-empty chunks through Pallas.
    nz = [i for i in range(n_out) if sizes[i] > 0]
    if not nz:
        return tuple(jnp.zeros(s, x.dtype) for s in out_shapes_all)
    chunks = [(split_idx[i], sizes[i]) for i in nz]
    out_shapes = tuple(jax.ShapeDtypeStruct(out_shapes_all[i], x.dtype) for i in nz)

    total_bytes = x.size * itemsize
    tiny = total_bytes <= _TINY_BYTES

    # Tile-alignment of every split boundary decides whether each chunk is a
    # plain rectangular HBM region (pure-DMA path) or needs sub-tile handling.
    if axis < ndim - 2:
        aligned = True
    elif axis == ndim - 2:
        aligned = all(i % sub_tile == 0 for i in split_idx)
    else:
        aligned = all(i % _LANE == 0 for i in split_idx)

    if aligned and not tiny:
        outs = _dma_split(x, axis, chunks, out_shapes)
    elif tiny:
        outs = _tiny_vmem_split(x, axis, chunks, out_shapes)
    else:
        outs = _gridded_vmem_split(x, axis, chunks, out_shapes, sub_tile, itemsize)

    # Re-insert any zero-sized chunks in their original positions.
    result = [None] * n_out
    for k, i in enumerate(nz):
        result[i] = outs[k]
    for i in range(n_out):
        if result[i] is None:
            result[i] = jnp.zeros(out_shapes_all[i], x.dtype)
    return tuple(result)


# ---------------------------------------------------------------------------
# Self-test
# ---------------------------------------------------------------------------

def _reference(x, axis, split_size_or_sections):
    split_idx = _compute_split_idx(x.shape[axis], split_size_or_sections)
    return jnp.split(x, split_idx[1:-1], axis=axis)


def _check(x, axis, spec):
    outs = jax.block_until_ready(split_pallas(x, axis, spec))
    refs = _reference(x, axis, spec)
    assert len(outs) == len(refs)
    for o, r in zip(outs, refs):
        assert o.shape == r.shape and o.dtype == r.dtype
        np.testing.assert_array_equal(np.asarray(o), np.asarray(r))


if __name__ == "__main__":
    key = jax.random.PRNGKey(0)
    k0, k1, k2, k3 = jax.random.split(key, 4)

    # Module config: in_size = (4, 16, 16) (C, H, W; batch excluded), batch=2.
    x_small = jax.random.normal(k0, (2, 4, 16, 16), dtype=jnp.float32)

    # Case 1: uniform chunk size on channels (tiny -> single VMEM slab path)
    _check(x_small, 1, 2)
    # Case 2: explicit sections on channels (tiny path)
    _check(x_small, 1, [1, 3])
    # Case 3: split on the sublane dim (tiny path)
    _check(x_small, 2, 8)

    # Larger tensor (4 MiB) to exercise the DMA paths.
    x_big = jax.random.normal(k1, (4, 8, 128, 256), dtype=jnp.float32)
    # Case 4: outer-axis split -> pure HBM->HBM DMA path
    _check(x_big, 1, 4)
    # Case 5: sublane split with 8-aligned boundaries -> DMA path
    _check(x_big, 2, [48, 80])
    # Case 6: lane split with 128-aligned boundaries -> DMA path
    _check(x_big, 3, 128)

    # Case 7: misaligned sublane split -> gridded, double-buffered VMEM fallback
    x_mis = jax.random.normal(k2, (2, 8, 264, 256), dtype=jnp.float32)
    _check(x_mis, 2, [100, 164])

    # Case 8: misaligned lane split -> gridded VMEM fallback (documented slow path)
    x_lane = jax.random.normal(k3, (2, 8, 64, 384), dtype=jnp.float32)
    _check(x_lane, 3, [100, 284])

    print("KERNEL_OK")
</pallas_src>

<mosaic_0001>
module attributes {stable_mosaic.version = 11 : i64} {
  func.func @kernel(%arg0: memref<2x4x16x16xf32, #tpu.memory_space<vmem>>, %arg1: memref<2x2x16x16xf32, #tpu.memory_space<vmem>>, %arg2: memref<2x2x16x16xf32, #tpu.memory_space<vmem>>) attributes {dimension_semantics = [], scalar_prefetch = 0 : i64, scratch_operands = 0 : i64, tpu.core_type = #tpu.core_type<tc>} {
    %c0 = arith.constant 0 : index
    %c0_0 = arith.constant 0 : index
    %c0_1 = arith.constant 0 : index
    %c0_2 = arith.constant 0 : index
    %0 = vector.load %arg0[%c0, %c0_0, %c0_1, %c0_2] : memref<2x4x16x16xf32, #tpu.memory_space<vmem>>, vector<2x2x16x16xf32>
    %c0_3 = arith.constant 0 : index
    %c0_4 = arith.constant 0 : index
    %c0_5 = arith.constant 0 : index
    %c0_6 = arith.constant 0 : index
    %1 = vector.load %arg1[%c0_3, %c0_4, %c0_5, %c0_6] : memref<2x2x16x16xf32, #tpu.memory_space<vmem>>, vector<2x2x16x16xf32>
    tpu.vector_store %arg1[%c0_3, %c0_4, %c0_5, %c0_6], %0 {strides = array<i32>} : memref<2x2x16x16xf32, #tpu.memory_space<vmem>>, vector<2x2x16x16xf32>,
    %c0_7 = arith.constant 0 : index
    %c2 = arith.constant 2 : index
    %c0_8 = arith.constant 0 : index
    %c0_9 = arith.constant 0 : index
    %2 = vector.load %arg0[%c0_7, %c2, %c0_8, %c0_9] : memref<2x4x16x16xf32, #tpu.memory_space<vmem>>, vector<2x2x16x16xf32>
    %c0_10 = arith.constant 0 : index
    %c0_11 = arith.constant 0 : index
    %c0_12 = arith.constant 0 : index
    %c0_13 = arith.constant 0 : index
    %3 = vector.load %arg2[%c0_10, %c0_11, %c0_12, %c0_13] : memref<2x2x16x16xf32, #tpu.memory_space<vmem>>, vector<2x2x16x16xf32>
    tpu.vector_store %arg2[%c0_10, %c0_11, %c0_12, %c0_13], %2 {strides = array<i32>} : memref<2x2x16x16xf32, #tpu.memory_space<vmem>>, vector<2x2x16x16xf32>,
    return
  }
}

</mosaic_0001>

<bundles_post_ra>
// kernel: tpu_custom_call.1
= control target key start
LH: loop header
LB: loop body
LE: loop exit
PB: predicated region body
PF: predicated region fallthrough
CT: control target
= control target key end

     0   :  { %8 = vsyncpa [#allocation3], 0  ;;  %s265_s0 = inlined_call_operand.hbm [shape: f32[2,4,16,16], index: 0, kind: input, shape index: {}]   ;;  %s266_s1 = inlined_call_operand.hbm [shape: f32[2,2,16,16], index: 1, kind: output, shape index: {0}]   ;;  %s267_s2 = inlined_call_operand.hbm [shape: f32[2,2,16,16], index: 2, kind: output, shape index: {1}]  }
   0x1   :  { %9 = vsyncpa [#allocation4], 0 }
   0x2   :  { %10 = vsyncpa [#allocation7], 0  ;;  %s170_s9 = smov [#allocation2]   ;;  %s98_s13 = scalar_lea.hbm %s265_s0, 2048 }
   0x3   :  { %s16_s10 = sshll.u32 %s170_s9, 4  ;;  %p99_p0 = scmp.ne.s32.totalorder %s265_s0, %s98_s13  ;;  %s17_s10 = int_to_ptr.vmem [resolvable:$true] %s16_s10 }
   0x4   :  { %p102_p1 = scmp.lt.u32.totalorder %s98_s13, %s265_s0 }
   0x6   :  { %p104_p2 = pnand %p102_p1, %p99_p0 }
   0x8   :  { %107 = shalt.err (!%p104_p2)
}
   0x9   :  { %s108_s18 = scalar_lea.vmem %s17_s10, 2048  ;;  %p113_p4 = scmp.lt.s32.totalorder %s17_s10, %s17_s10 }
   0xa   :  { %p109_p3 = scmp.ne.s32.totalorder %s17_s10, %s108_s18  ;;  %p114_p5 = scmp.lt.s32.totalorder %s108_s18, %s108_s18 }
   0xc   :  { %p115_p6 = por %p114_p5, %p113_p4 }
   0xe   :  { %p116_p7 = pnand %p115_p6, %p109_p3 }
  0x10   :  { %119 = shalt.err (!%p116_p7)
}
  0x11   :  { %s171_s19 = smov 128   ;;  %s172_s20 = smov 8  }
  0x12   :  { %22 = dma.hbm_to_vmem [thread:$0]  %s265_s0, 2048, %s17_s10, [#allocation3], %s171_s19, %s171_s19, %s172_s20  }
  0x13   :  { %164 = dma.done.wait [#allocation3], 2048  }
  0x14   :  { %165 = vsyncadd [#allocation3], 4294965248  ;;  %vm34_vm0 = vcmask 130048   ;;  %s173_s23 = smov [#allocation5]   ;;  %v26_v0 = vld [vmem:[#allocation2] sm:$0xff]  ;;  %v27_v1 = vld [vmem:[#allocation2 + $0x8] sm:$0xff] }
  0x15   :  { %s65_s24 = sshll.u32 %s173_s23, 4  ;;  %v28_v2 = vld [vmem:[#allocation2 + $0x10] sm:$0xff]  ;;  %s174_s25 = smov [#allocation6]   ;;  %35 = vst.msk [vmem:[#allocation5] sm:$0xff] %vm34_vm0, %v26_v0  ;;  %36 = vst.msk [vmem:[#allocation5 + $0x8] sm:$0xff] %vm34_vm0, %v27_v1  ;;  %v29_v3 = vld [vmem:[#allocation2 + $0x18] sm:$0xff]  ;;  %s208_s24 = int_to_ptr.vmem [resolvable:$true] %s65_s24 }
  0x16   :  { %s77_s26 = sshll.u32 %s174_s25, 4  ;;  %37 = vst.msk [vmem:[#allocation5 + $0x10] sm:$0xff] %vm34_vm0, %v28_v2  ;;  %v30_v4 = vld [vmem:[#allocation2 + $0x40] sm:$0xff]  ;;  %v31_v5 = vld [vmem:[#allocation2 + $0x48] sm:$0xff]  ;;  %38 = vst.msk [vmem:[#allocation5 + $0x18] sm:$0xff] %vm34_vm0, %v29_v3  ;;  %s120_s0 = scalar_lea.vmem %s208_s24, 1024  ;;  %s216_s26 = int_to_ptr.vmem [resolvable:$true] %s77_s26 }
  0x17   :  { %39 = vst.msk [vmem:[#allocation5 + $0x20] sm:$0xff] %vm34_vm0, %v30_v4  ;;  %40 = vst.msk [vmem:[#allocation5 + $0x28] sm:$0xff] %vm34_vm0, %v31_v5  ;;  %v32_v6 = vld [vmem:[#allocation2 + $0x50] sm:$0xff]  ;;  %v33_v7 = vld [vmem:[#allocation2 + $0x58] sm:$0xff]  ;;  %p121_p8 = scmp.ne.s32.totalorder %s208_s24, %s120_s0  ;;  %p125_p9 = scmp.lt.s32.totalorder %s208_s24, %s208_s24 }
  0x18   :  { %v44_v8 = vld [vmem:[#allocation2 + $0x20] sm:$0xff]  ;;  %41 = vst.msk [vmem:[#allocation5 + $0x30] sm:$0xff] %vm34_vm0, %v32_v6  ;;  %42 = vst.msk [vmem:[#allocation5 + $0x38] sm:$0xff] %vm34_vm0, %v33_v7  ;;  %v45_v9 = vld [vmem:[#allocation2 + $0x28] sm:$0xff]  ;;  %p126_p10 = scmp.lt.s32.totalorder %s120_s0, %s120_s0 }
  0x19   :  { %52 = vst.msk [vmem:[#allocation6] sm:$0xff] %vm34_vm0, %v44_v8  ;;  %v46_v10 = vld [vmem:[#allocation2 + $0x30] sm:$0xff]  ;;  %v47_v11 = vld [vmem:[#allocation2 + $0x38] sm:$0xff]  ;;  %53 = vst.msk [vmem:[#allocation6 + $0x8] sm:$0xff] %vm34_vm0, %v45_v9 }
  0x1a   :  { %54 = vst.msk [vmem:[#allocation6 + $0x10] sm:$0xff] %vm34_vm0, %v46_v10  ;;  %55 = vst.msk [vmem:[#allocation6 + $0x18] sm:$0xff] %vm34_vm0, %v47_v11  ;;  %v48_v12 = vld [vmem:[#allocation2 + $0x60] sm:$0xff]  ;;  %v49_v13 = vld [vmem:[#allocation2 + $0x68] sm:$0xff]  ;;  %p127_p11 = por %p126_p10, %p125_p9 }
  0x1b   :  { %v50_v14 = vld [vmem:[#allocation2 + $0x70] sm:$0xff] }
  0x1c   :  { %p128_p12 = pnand %p127_p11, %p121_p8 }
  0x1e   :  { %131 = shalt.err (!%p128_p12)
}
  0x1f   :  { %s132_s29 = scalar_lea.hbm %s266_s1, 1024 }
  0x20   :  { %p133_p13 = scmp.ne.s32.totalorder %s266_s1, %s132_s29  ;;  %p136_p0 = scmp.lt.u32.totalorder %s132_s29, %s266_s1 }
  0x22   :  { %p138_p1 = pnand %p136_p0, %p133_p13 }
  0x24   :  { %141 = shalt.err (!%p138_p1)
}
  0x25   :  { %71 = dma.vmem_to_hbm [thread:$0]  %s208_s24, 1024, %s266_s1, [#allocation4], %s171_s19, %s171_s19, %s172_s20   ;;  %56 = vst.msk [vmem:[#allocation6 + $0x20] sm:$0xff] %vm34_vm0, %v48_v12  ;;  %57 = vst.msk [vmem:[#allocation6 + $0x28] sm:$0xff] %vm34_vm0, %v49_v13  ;;  %v51_v15 = vld [vmem:[#allocation2 + $0x78] sm:$0xff] }
  0x26   :  { %58 = vst.msk [vmem:[#allocation6 + $0x30] sm:$0xff] %vm34_vm0, %v50_v14  ;;  %59 = vst.msk [vmem:[#allocation6 + $0x38] sm:$0xff] %vm34_vm0, %v51_v15  ;;  %s142_s8 = scalar_lea.vmem %s216_s26, 1024  ;;  %p147_p3 = scmp.lt.s32.totalorder %s216_s26, %s216_s26 }
  0x27   :  { %p143_p2 = scmp.ne.s32.totalorder %s216_s26, %s142_s8  ;;  %p148_p4 = scmp.lt.s32.totalorder %s142_s8, %s142_s8 }
  0x29   :  { %p149_p5 = por %p148_p4, %p147_p3 }
  0x2b   :  { %p150_p6 = pnand %p149_p5, %p143_p2 }
  0x2d   :  { %153 = shalt.err (!%p150_p6)
}
  0x2e   :  { %s154_s1 = scalar_lea.hbm %s267_s2, 1024 }
  0x2f   :  { %p155_p7 = scmp.ne.s32.totalorder %s267_s2, %s154_s1  ;;  %p158_p8 = scmp.lt.u32.totalorder %s154_s1, %s267_s2 }
  0x31   :  { %p160_p9 = pnand %p158_p8, %p155_p7 }
  0x33   :  { %163 = shalt.err (!%p160_p9)
}
  0x34   :  { %83 = dma.vmem_to_hbm [thread:$0]  %s216_s26, 1024, %s267_s2, [#allocation7], %s171_s19, %s171_s19, %s172_s20  }
  0x35   :  { %166 = dma.done.wait [#allocation4], 1024  }
  0x36   :  { %167 = vsyncadd [#allocation4], 4294966272 }
  0x37   :  { %168 = dma.done.wait [#allocation7], 1024  }
  0x38   :  { %169 = vsyncadd [#allocation7], 4294966272 }
  0x39   :  { %90 = vsyncpa [#allocation3], 1 }
  0x3a   :  { %91 = vsyncpa [#allocation4], 1 }
  0x3b   :  { %92 = vsyncpa [#allocation7], 1 }

</bundles_post_ra>
